<compile_context>
chip_gen: v6e
topology: v6e:2x2x1
jax: 0.10.0
libtpu: 0.0.40
codegen_flags: <defaults>
</compile_context>

<pallas_src>
import jax
import jax.numpy as jnp
from jax.experimental import pallas as pl
from jax.experimental.pallas import tpu as pltpu


def _round_up(x: int, m: int) -> int:
    return ((x + m - 1) // m) * m


def _make_kernel(k_total: int, tk: int, acc_in_out: bool, compute_dtype):
    """Builds the kernel body with static (trace-time) configuration."""
    mask_k_tail = (k_total % tk) != 0

    def _load_operands(x_ref, w_ref, k):
        x = x_ref[...]
        w = w_ref[...]
        if mask_k_tail:
            # Zero the out-of-range K columns of X so that (masked X) *
            # (zero-padded W K-rows) contributes exactly 0 -- no wrapper-side
            # padding of X required.
            col = jax.lax.broadcasted_iota(jnp.int32, x.shape, 1) + k * tk
            x = jnp.where(col < k_total, x, jnp.zeros_like(x))
        if compute_dtype is not None:
            x = x.astype(compute_dtype)
            w = w.astype(compute_dtype)
        return x, w

    if acc_in_out:
        # float32 output: accumulate directly into the resident output block.
        def kernel(x_ref, w_ref, b_ref, o_ref):
            k = pl.program_id(2)

            @pl.when(k == 0)
            def _init():
                o_ref[...] = jnp.zeros_like(o_ref)

            x, w = _load_operands(x_ref, w_ref, k)
            o_ref[...] += jnp.dot(x, w, preferred_element_type=jnp.float32)

            @pl.when(k == pl.num_programs(2) - 1)
            def _finalize():
                out = o_ref[...] + b_ref[...].astype(jnp.float32)
                o_ref[...] = jnp.maximum(out, 0.0)

        return kernel

    # Low-precision output: keep a dedicated f32 VMEM accumulator.
    def kernel(x_ref, w_ref, b_ref, o_ref, acc_ref):
        k = pl.program_id(2)

        @pl.when(k == 0)
        def _init():
            acc_ref[...] = jnp.zeros_like(acc_ref)

        x, w = _load_operands(x_ref, w_ref, k)
        acc_ref[...] += jnp.dot(x, w, preferred_element_type=jnp.float32)

        @pl.when(k == pl.num_programs(2) - 1)
        def _finalize():
            out = acc_ref[...] + b_ref[...].astype(jnp.float32)
            o_ref[...] = jnp.maximum(out, 0.0).astype(o_ref.dtype)

    return kernel


def mylinear(
    x,
    w,
    b,
    *,
    tm: int = 512,
    tn: int = 512,
    tk: int = 1024,
    compute_dtype=None,
    vmem_limit_bytes: int = 48 * 1024 * 1024,
):
    """Computes relu(x @ w + b) with a tiled Pallas TPU kernel."""
    M, K = x.shape
    Kw, N = w.shape
    assert K == Kw and b.shape == (N,)

    # Clamp tiles to the (aligned) problem size: tm multiple of 8, tn/tk
    # multiples of 128 (lane-dense, MXU-friendly).
    tm = min(tm, _round_up(M, 8))
    tk = min(tk, _round_up(K, 128))
    tn = min(tn, _round_up(N, 128))

    grid = (pl.cdiv(M, tm), pl.cdiv(N, tn), pl.cdiv(K, tk))
    Kp = grid[2] * tk

    # Pad only the static weight along K (zeros) so the masked X K-tail meets
    # exact zeros.  X, bias and the output stay unpadded (Pallas masks the
    # boundary loads/stores), avoiding extra HBM passes over activations.
    wp = w if Kp == K else jnp.pad(w, ((0, Kp - K), (0, 0)))
    b2d = b.reshape(1, N)

    out_dtype = x.dtype
    acc_in_out = out_dtype == jnp.float32
    kernel = _make_kernel(K, tk, acc_in_out, compute_dtype)
    scratch = [] if acc_in_out else [pltpu.VMEM((tm, tn), jnp.float32)]

    cost = pl.CostEstimate(
        flops=2 * M * N * K,
        transcendentals=0,
        bytes_accessed=(
            M * K * x.dtype.itemsize
            + K * N * w.dtype.itemsize
            + N * b.dtype.itemsize
            + M * N * jnp.dtype(out_dtype).itemsize
        ),
    )

    return pl.pallas_call(
        kernel,
        out_shape=jax.ShapeDtypeStruct((M, N), out_dtype),
        grid_spec=pltpu.PrefetchScalarGridSpec(
            num_scalar_prefetch=0,
            grid=grid,
            in_specs=[
                pl.BlockSpec((tm, tk), lambda i, j, k: (i, k)),   # X tile
                pl.BlockSpec((tk, tn), lambda i, j, k: (k, j)),   # W tile
                pl.BlockSpec((1, tn), lambda i, j, k: (0, j)),    # bias (N only)
            ],
            out_specs=pl.BlockSpec((tm, tn), lambda i, j, k: (i, j)),
            scratch_shapes=scratch,
        ),
        compiler_params=pltpu.CompilerParams(
            dimension_semantics=("parallel", "parallel", "arbitrary"),
            vmem_limit_bytes=vmem_limit_bytes,
        ),
        cost_estimate=cost,
    )(x, wp, b2d)


if __name__ == "__main__":
    key = jax.random.PRNGKey(0)
    k_x, k_w, k_b = jax.random.split(key, 3)

    # Small shapes matching the module's forward: (batch, in_units) @ (in_units, units).
    batch, in_units, units = 8, 32, 64
    x = jax.random.normal(k_x, (batch, in_units), dtype=jnp.float32)
    w = jax.random.normal(k_w, (in_units, units), dtype=jnp.float32)
    b = jax.random.normal(k_b, (units,), dtype=jnp.float32)

    out = mylinear(x, w, b)
    jax.block_until_ready(out)

    ref = jnp.maximum(x @ w + b, 0.0)
    assert out.shape == (batch, units)
    assert jnp.allclose(out, ref, atol=1e-5, rtol=1e-5)

    # Larger, deliberately unaligned problem: multi-block M/N grid, K that does
    # not divide tk (exercises the in-kernel K-tail masking + weight K-pad),
    # and masked boundary output stores.
    M2, K2, N2 = 520, 1500, 700
    x2 = jax.random.normal(k_x, (M2, K2), dtype=jnp.float32)
    w2 = jax.random.normal(k_w, (K2, N2), dtype=jnp.float32)
    b2 = jax.random.normal(k_b, (N2,), dtype=jnp.float32)
    out2 = mylinear(x2, w2, b2)
    jax.block_until_ready(out2)
    ref2 = jnp.maximum(x2 @ w2 + b2, 0.0)
    assert out2.shape == (M2, N2)
    assert jnp.allclose(out2, ref2, atol=1e-3, rtol=1e-3)

    print("KERNEL_OK")
</pallas_src>

<mosaic_0001>
module attributes {stable_mosaic.version = 11 : i64} {
  func.func @kernel(%arg0: i32, %arg1: i32, %arg2: i32, %arg3: memref<8x128xf32, #tpu.memory_space<vmem>>, %arg4: memref<128x128xf32, #tpu.memory_space<vmem>>, %arg5: memref<1x128xf32, #tpu.memory_space<vmem>>, %arg6: memref<8x128xf32, #tpu.memory_space<vmem>>) attributes {dimension_semantics = [#tpu.dimension_semantics<parallel>, #tpu.dimension_semantics<parallel>, #tpu.dimension_semantics<arbitrary>], iteration_bounds = array<i64: 1, 1, 1>, scalar_prefetch = 0 : i64, scratch_operands = 0 : i64, tpu.core_type = #tpu.core_type<tc>, window_params = [{transform_indices = @transform_0, window_bounds = array<i64: 8, 128>}, {transform_indices = @transform_1, window_bounds = array<i64: 128, 128>}, {transform_indices = @transform_2, window_bounds = array<i64: 1, 128>}, {transform_indices = @transform_3, window_bounds = array<i64: 8, 128>}]} {
    %c0_i32 = arith.constant 0 : i32
    %0 = arith.cmpi eq, %arg2, %c0_i32 : i32
    %1 = arith.extui %0 : i1 to i32
    %c0_i32_0 = arith.constant 0 : i32
    %2 = arith.cmpi ne, %1, %c0_i32_0 : i32
    scf.if %2 {
      %cst_11 = arith.constant 0.000000e+00 : f32
      %20 = vector.broadcast %cst_11 : f32 to vector<8x128xf32>
      %c0_12 = arith.constant 0 : index
      %c0_13 = arith.constant 0 : index
      %21 = vector.load %arg6[%c0_12, %c0_13] : memref<8x128xf32, #tpu.memory_space<vmem>>, vector<8x128xf32>
      tpu.vector_store %arg6[%c0_12, %c0_13], %20 {strides = array<i32>} : memref<8x128xf32, #tpu.memory_space<vmem>>, vector<8x128xf32>,
    } else {
    }
    %c0 = arith.constant 0 : index
    %c0_1 = arith.constant 0 : index
    %3 = vector.load %arg3[%c0, %c0_1] : memref<8x128xf32, #tpu.memory_space<vmem>>, vector<8x128xf32>
    %c0_2 = arith.constant 0 : index
    %c0_3 = arith.constant 0 : index
    %4 = vector.load %arg4[%c0_2, %c0_3] : memref<128x128xf32, #tpu.memory_space<vmem>>, vector<128x128xf32>
    %5 = tpu.iota {dimensions = array<i32: 1>} : vector<8x128xi32>
    %c128_i32 = arith.constant 128 : i32
    %6 = arith.muli %arg2, %c128_i32 : i32
    %7 = vector.broadcast %6 : i32 to vector<8x128xi32>
    %8 = arith.addi %5, %7 : vector<8x128xi32>
    %c32_i32 = arith.constant 32 : i32
    %9 = vector.broadcast %c32_i32 : i32 to vector<8x128xi32>
    %10 = arith.cmpi slt, %8, %9 : vector<8x128xi32>
    %cst = arith.constant 0.000000e+00 : f32
    %11 = vector.broadcast %cst : f32 to vector<8x128xf32>
    %12 = arith.select %10, %3, %11 : vector<8x128xi1>, vector<8x128xf32>
    %c0_4 = arith.constant 0 : index
    %c0_5 = arith.constant 0 : index
    %13 = vector.load %arg6[%c0_4, %c0_5] : memref<8x128xf32, #tpu.memory_space<vmem>>, vector<8x128xf32>
    %cst_6 = arith.constant dense<0.000000e+00> : vector<8x128xf32>
    %14 = tpu.matmul %12, %4, %cst_6 {dimension_numbers = #tpu.dot_dimension_numbers<[1], [0], [0], [1], [0, 0, 1, 1], [], []>} : vector<8x128xf32>, vector<128x128xf32>, vector<8x128xf32> -> vector<8x128xf32>
    %15 = arith.addf %13, %14 : vector<8x128xf32>
    %c0_7 = arith.constant 0 : index
    %c0_8 = arith.constant 0 : index
    %16 = vector.load %arg6[%c0_7, %c0_8] : memref<8x128xf32, #tpu.memory_space<vmem>>, vector<8x128xf32>
    tpu.vector_store %arg6[%c0_7, %c0_8], %15 {strides = array<i32>} : memref<8x128xf32, #tpu.memory_space<vmem>>, vector<8x128xf32>,
    %c0_i32_9 = arith.constant 0 : i32
    %17 = arith.cmpi eq, %arg2, %c0_i32_9 : i32
    %18 = arith.extui %17 : i1 to i32
    %c0_i32_10 = arith.constant 0 : i32
    %19 = arith.cmpi ne, %18, %c0_i32_10 : i32
    scf.if %19 {
      %c0_11 = arith.constant 0 : index
      %c0_12 = arith.constant 0 : index
      %20 = vector.load %arg6[%c0_11, %c0_12] : memref<8x128xf32, #tpu.memory_space<vmem>>, vector<8x128xf32>
      %c0_13 = arith.constant 0 : index
      %c0_14 = arith.constant 0 : index
      %21 = vector.load %arg5[%c0_13, %c0_14] : memref<1x128xf32, #tpu.memory_space<vmem>>, vector<1x128xf32>
      %22 = vector.broadcast %21 : vector<1x128xf32> to vector<8x128xf32>
      %23 = arith.addf %20, %22 : vector<8x128xf32>
      %cst_15 = arith.constant 0.000000e+00 : f32
      %24 = vector.broadcast %cst_15 : f32 to vector<8x128xf32>
      %25 = arith.maximumf %23, %24 : vector<8x128xf32>
      %c0_16 = arith.constant 0 : index
      %c0_17 = arith.constant 0 : index
      %26 = vector.load %arg6[%c0_16, %c0_17] : memref<8x128xf32, #tpu.memory_space<vmem>>, vector<8x128xf32>
      tpu.vector_store %arg6[%c0_16, %c0_17], %25 {strides = array<i32>} : memref<8x128xf32, #tpu.memory_space<vmem>>, vector<8x128xf32>,
    } else {
    }
    return
  }
  func.func @transform_0(%arg0: i32, %arg1: i32, %arg2: i32) -> (i32, i32) {
    %c0_i32 = arith.constant 0 : i32
    return %arg0, %arg2 : i32, i32
  }
  func.func @transform_1(%arg0: i32, %arg1: i32, %arg2: i32) -> (i32, i32) {
    %c0_i32 = arith.constant 0 : i32
    return %arg2, %arg1 : i32, i32
  }
  func.func @transform_2(%arg0: i32, %arg1: i32, %arg2: i32) -> (i32, i32) {
    %c0_i32 = arith.constant 0 : i32
    %c0_i32_0 = arith.constant 0 : i32
    return %c0_i32, %arg1 : i32, i32
  }
  func.func @transform_3(%arg0: i32, %arg1: i32, %arg2: i32) -> (i32, i32) {
    %c0_i32 = arith.constant 0 : i32
    return %arg0, %arg1 : i32, i32
  }
}

</mosaic_0001>

<bundles_post_ra>
// kernel: tpu_custom_call.1
= control target key start
LH: loop header
LB: loop body
LE: loop exit
PB: predicated region body
PF: predicated region fallthrough
CT: control target
= control target key end

     0   :  { %v224_v1 = vmov 0.0   ;;  %vm225_vm0 = vmmov 0   ;;  %s304_s0 = inlined_call_operand.vmem [shape: f32[8,32], index: 0, kind: input, shape index: {}]   ;;  %s305_s1 = inlined_call_operand.vmem [shape: f32[128,64], index: 1, kind: input, shape index: {}]   ;;  %s306_s2 = inlined_call_operand.vmem [shape: f32[1,64], index: 2, kind: input, shape index: {}]   ;;  %s307_s3 = inlined_call_operand.hbm [shape: f32[8,64], index: 3, kind: output, shape index: {}]  }
   0x1   :  { %v36_v0 = vld [vmem:[%s305_s1 + $0x78] sm:$0xff]  ;;  %164 = vmatprep.subr.mxu0 %v224_v1  ;;  %v35_v2 = vld [vmem:[%s305_s1 + $0x70] sm:$0xff]  ;;  %196 = vmatprep.mubr.msk.f32.mxu0 %vm225_vm0, %v224_v1  ;;  %v34_v3 = vld [vmem:[%s305_s1 + $0x68] sm:$0xff] }
   0x2   :  { %165 = vmatpush3.msra.mxu0 %v36_v0  ;;  %v33_v4 = vld [vmem:[%s305_s1 + $0x60] sm:$0xff] }
   0x3   :  { %166 = vmatprep.subr.mxu0 %v224_v1 }
   0x4   :  { %167 = vmatpush3.msra.mxu0 %v35_v2 }
   0x5   :  { %168 = vmatprep.subr.mxu0 %v224_v1 }
   0x6   :  { %8 = vsyncpa [#allocation3], 0  ;;  %169 = vmatpush3.msra.mxu0 %v34_v3  ;;  %v32_v5 = vld [vmem:[%s305_s1 + $0x58] sm:$0xff]  ;;  %v31_v6 = vld [vmem:[%s305_s1 + $0x50] sm:$0xff]  ;;  %v37_v13 = vlaneseq  ;;  %s226_s21 = smov [#allocation2]  }
   0x7   :  { %170 = vmatprep.subr.mxu0 %v224_v1  ;;  %v30_v7 = vld [vmem:[%s305_s1 + $0x48] sm:$0xff]  ;;  %v29_v8 = vld [vmem:[%s305_s1 + $0x40] sm:$0xff]  ;;  %v28_v9 = vld [vmem:[%s305_s1 + $0x38] sm:$0xff]  ;;  %s137_s22 = sshll.u32 %s226_s21, 4  ;;  %s138_s22 = int_to_ptr.vmem [resolvable:$true] %s137_s22 }
   0x8   :  { %171 = vmatpush3.msra.mxu0 %v33_v4  ;;  %v27_v10 = vld [vmem:[%s305_s1 + $0x30] sm:$0xff]  ;;  %v26_v11 = vld [vmem:[%s305_s1 + $0x28] sm:$0xff]  ;;  %v25_v12 = vld [vmem:[%s305_s1 + $0x20] sm:$0xff]  ;;  %v38_v16 = vand.u32 127, %v37_v13  ;;  %p207_p1 = scmp.lt.s32.totalorder %s138_s22, %s138_s22 }
   0x9   :  { %172 = vmatprep.subr.mxu0 %v224_v1  ;;  %v24_v14 = vld [vmem:[%s305_s1 + $0x18] sm:$0xff]  ;;  %v23_v15 = vld [vmem:[%s305_s1 + $0x10] sm:$0xff]  ;;  %v22_v17 = vld [vmem:[%s305_s1 + $0x8] sm:$0xff] }
   0xa   :  { %173 = vmatpush3.msra.mxu0 %v32_v5  ;;  %v21_v18 = vld [vmem:[%s305_s1] sm:$0xff]  ;;  %vm42_vm1 = vcmp.lt.s32.totalorder %v38_v16, 32  ;;  %s202_s1 = scalar_lea.vmem %s138_s22, 128 }
   0xb   :  { %174 = vmatprep.subr.mxu0 %v224_v1  ;;  %v20_v19 = vld [vmem:[%s304_s0] sm:$0xff]  ;;  %p203_p0 = scmp.ne.s32.totalorder %s138_s22, %s202_s1  ;;  %p208_p2 = scmp.lt.s32.totalorder %s202_s1, %s202_s1 }
   0xc   :  { %175 = vmatpush3.msra.mxu0 %v31_v6  ;;  %v146_v21 = vld [vmem:[%s306_s2] ss:$0 sm:$0xff] }
   0xd   :  { %176 = vmatprep.subr.mxu0 %v224_v1  ;;  %p209_p3 = por %p208_p2, %p207_p1 }
   0xe   :  { %177 = vmatpush3.msra.mxu0 %v30_v7 }
   0xf   :  { %178 = vmatprep.subr.mxu0 %v224_v1  ;;  %p210_p4 = pnand %p209_p3, %p203_p0 }
  0x10   :  { %179 = vmatpush3.msra.mxu0 %v29_v8 }
  0x11   :  { %180 = vmatprep.subr.mxu0 %v224_v1 }
  0x12   :  { %181 = vmatpush3.msra.mxu0 %v28_v9 }
  0x13   :  { %182 = vmatprep.subr.mxu0 %v224_v1 }
  0x14   :  { %183 = vmatpush3.msra.mxu0 %v27_v10 }
  0x15   :  { %184 = vmatprep.subr.mxu0 %v224_v1 }
  0x16   :  { %185 = vmatpush3.msra.mxu0 %v26_v11 }
  0x17   :  { %186 = vmatprep.subr.mxu0 %v224_v1 }
  0x18   :  { %187 = vmatpush3.msra.mxu0 %v25_v12 }
  0x19   :  { %188 = vmatprep.subr.mxu0 %v224_v1 }
  0x1a   :  { %189 = vmatpush3.msra.mxu0 %v24_v14 }
  0x1b   :  { %190 = vmatprep.subr.mxu0 %v224_v1 }
  0x1c   :  { %191 = vmatpush3.msra.mxu0 %v23_v15 }
  0x1d   :  { %192 = vmatprep.subr.mxu0 %v224_v1 }
  0x1e   :  { %193 = vmatpush3.msra.mxu0 %v22_v17 }
  0x1f   :  { %194 = vmatprep.subr.mxu0 %v224_v1 }
  0x20   :  { %195 = vmatpush3.msra.mxu0 %v21_v18 }
  0x21   :  { %197 = vmatmul.mubr.msk.f32.vlgmr.msra.gmra.mxu0 %vm42_vm1, %v20_v19 }
  0xe1   :  { %v111_v20 = vpop.f32.mrf.mxu0 }
  0xe2   :  { %v128_v23 = vadd.f32 %v146_v21, %v111_v20 }
  0xe3   :  { %v198_v22 = vpop.f32.mrf.mxu0 }
  0xe4   :  { %v129_v24 = vmax.f32 %v128_v23, 0.0 }
  0xe6   :  { %130 = vst [vmem:[#allocation2] sm:$0xff] %v129_v24 }
  0xe7   :  { %213 = shalt.err (!%p210_p4)
}
  0xe8   :  { %140 = dma.vmem_to_hbm [thread:$0]  %s138_s22, 128, %s307_s3, [#allocation3]  }
  0xe9   :  { %222 = dma.done.wait [#allocation3], 128  }
  0xea   :  { %223 = vsyncadd [#allocation3], 4294967168 }
  0xeb   :  { %144 = vsyncpa [#allocation3], 1 }

</bundles_post_ra>
